<compile_context>
chip_gen: v7x
topology: tpu7x:2x2x1
jax: 0.10.0
libtpu: 0.0.40
codegen_flags: <defaults>
</compile_context>

<pallas_src>
import functools

import jax
import jax.numpy as jnp
from jax.experimental import pallas as pl
from jax.experimental.pallas import tpu as pltpu

TAU = 0.5


def _gumbel_softmax_kernel(w_ref, g_ref, attn_ref, *, inv_tau):
    """One-shot (1, F) gumbel-softmax over the feature (lane) axis."""
    logits = (w_ref[...] + g_ref[...]) * inv_tau              # (1, F)
    m = jnp.max(logits, axis=-1, keepdims=True)               # numerically stable
    e = jnp.exp(logits - m)
    attn_ref[...] = e / jnp.sum(e, axis=-1, keepdims=True)    # exact div (runs once)


def _scale_rows_kernel(attn_ref, x_ref, o_ref):
    """Streaming broadcast multiply: (tile_n, F) * (1, F) -> (tile_n, F)."""
    # Cast to f32 for the multiply (safe for bf16 inputs; no-op for f32),
    # cast back on store so o_ref's dtype always matches.
    o_ref[...] = (x_ref[...].astype(jnp.float32) * attn_ref[...]).astype(o_ref.dtype)


def model_node_attention(x, weight, gumbel_noise, *, tau=TAU, tile_n=2048):
    """Forward of ModelNodeAttention: x * softmax((weight + gumbel_noise) / tau).

    x: (N, F); weight, gumbel_noise: (F,).
    """
    N, F = x.shape
    w2 = weight.reshape(1, F).astype(jnp.float32)
    g2 = gumbel_noise.reshape(1, F).astype(jnp.float32)

    # ---- Step 1: feature attention, computed exactly once (removes per-step
    # softmax work and one redundant tiny DMA stream from the streaming kernel).
    attn = pl.pallas_call(
        functools.partial(_gumbel_softmax_kernel, inv_tau=1.0 / tau),
        out_shape=jax.ShapeDtypeStruct((1, F), jnp.float32),
        in_specs=[pl.BlockSpec((1, F), lambda: (0, 0)),
                  pl.BlockSpec((1, F), lambda: (0, 0))],
        out_specs=pl.BlockSpec((1, F), lambda: (0, 0)),
    )(w2, g2)

    # ---- Step 2: stream x through VMEM in large, lane-dense row tiles.
    # Pure HBM-bandwidth-bound kernel: pick the biggest row tile that keeps the
    # double-buffered (in + out) working set comfortable on every generation.
    # Target <= ~4 MiB per x block  =>  working set ~<= 16 MiB + attn.
    bytes_per_row = F * 4
    cap_rows = max(8, ((4 * 1024 * 1024) // bytes_per_row) // 8 * 8)
    tn = max(1, min(tile_n, cap_rows))
    tn = max(8, (tn // 8) * 8)          # sublane-aligned row tile
    if tn >= N:
        tn = N                          # single block (block dim == full dim is legal)
    grid = (pl.cdiv(N, tn),)            # trailing partial row tile is masked by Pallas

    # TODO(synk): if F >> 128 ever becomes huge, additionally block the feature axis
    # (multiples of 128 lanes); for typical nb_features the full row width is fine.
    return pl.pallas_call(
        _scale_rows_kernel,
        out_shape=jax.ShapeDtypeStruct((N, F), x.dtype),
        grid_spec=pltpu.PrefetchScalarGridSpec(
            num_scalar_prefetch=0,
            grid=grid,
            in_specs=[
                pl.BlockSpec((1, F), lambda i: (0, 0)),    # shared attention row
                pl.BlockSpec((tn, F), lambda i: (i, 0)),   # x row tile
            ],
            out_specs=pl.BlockSpec((tn, F), lambda i: (i, 0)),
        ),
        compiler_params=pltpu.CompilerParams(
            # Rows are independent -> on multi-TC chips (v7x) the row loop can be
            # split across TensorCores; no-op on single-TC v5e/v6e.
            dimension_semantics=("parallel",),
            # Headroom above v5e's 16 MiB default scoped VMEM; <= physical everywhere.
            vmem_limit_bytes=32 * 1024 * 1024,
        ),
    )(attn, x)


def _reference(x, weight, gumbel_noise, tau=TAU):
    return x * jax.nn.softmax((weight + gumbel_noise) / tau, axis=0)


if __name__ == "__main__":
    key = jax.random.PRNGKey(0)
    k_x, k_g = jax.random.split(key)

    num_nodes = 200          # deliberately NOT a multiple of the row tile
    nb_features = 128        # lane-dense feature axis

    # nn.Parameter(torch.ones(nb_features))
    weight = jnp.ones((nb_features,), dtype=jnp.float32)
    # TODO(synk): F.gumbel_softmax draws its gumbel noise internally from torch's RNG;
    # here the noise is passed in explicitly so the kernel is deterministic/testable.
    gumbel_noise = jax.random.gumbel(k_g, (nb_features,), dtype=jnp.float32)
    x = jax.random.normal(k_x, (num_nodes, nb_features), dtype=jnp.float32)

    ref = _reference(x, weight, gumbel_noise)

    # Default large-tile path (single 200x128 block).
    out = jax.block_until_ready(model_node_attention(x, weight, gumbel_noise))
    assert out.shape == x.shape and out.dtype == x.dtype
    assert jnp.allclose(out, ref, atol=1e-5, rtol=1e-5), "mismatch (default tile)"

    # Multi-block path with a masked trailing tile (grid = cdiv(200, 64) = 4).
    out_tiled = jax.block_until_ready(
        model_node_attention(x, weight, gumbel_noise, tile_n=64))
    assert jnp.allclose(out_tiled, ref, atol=1e-5, rtol=1e-5), "mismatch (tiled)"

    print("KERNEL_OK")
</pallas_src>

<mosaic_0001>
module attributes {stable_mosaic.version = 11 : i64} {
  func.func @_gumbel_softmax_kernel(%arg0: memref<1x128xf32, #tpu.memory_space<vmem>>, %arg1: memref<1x128xf32, #tpu.memory_space<vmem>>, %arg2: memref<1x128xf32, #tpu.memory_space<vmem>>) attributes {dimension_semantics = [], scalar_prefetch = 0 : i64, scratch_operands = 0 : i64, tpu.core_type = #tpu.core_type<tc>} {
    %c0 = arith.constant 0 : index
    %c0_0 = arith.constant 0 : index
    %0 = vector.load %arg0[%c0, %c0_0] : memref<1x128xf32, #tpu.memory_space<vmem>>, vector<1x128xf32>
    %c0_1 = arith.constant 0 : index
    %c0_2 = arith.constant 0 : index
    %1 = vector.load %arg1[%c0_1, %c0_2] : memref<1x128xf32, #tpu.memory_space<vmem>>, vector<1x128xf32>
    %2 = arith.addf %0, %1 : vector<1x128xf32>
    %cst = arith.constant 2.000000e+00 : f32
    %3 = vector.broadcast %cst : f32 to vector<1x128xf32>
    %4 = arith.mulf %2, %3 : vector<1x128xf32>
    %cst_3 = arith.constant dense<0xFF800000> : vector<1xf32>
    %5 = vector.multi_reduction <maximumf>, %4, %cst_3 [1] : vector<1x128xf32> to vector<1xf32>
    %6 = vector.shape_cast %5 : vector<1xf32> to vector<1x1xf32>
    %7 = vector.broadcast %6 : vector<1x1xf32> to vector<1x128xf32>
    %8 = arith.subf %4, %7 : vector<1x128xf32>
    %9 = math.exp %8 : vector<1x128xf32>
    %cst_4 = arith.constant dense<0.000000e+00> : vector<1xf32>
    %10 = vector.multi_reduction <add>, %9, %cst_4 [1] : vector<1x128xf32> to vector<1xf32>
    %11 = vector.shape_cast %10 : vector<1xf32> to vector<1x1xf32>
    %12 = vector.broadcast %11 : vector<1x1xf32> to vector<1x128xf32>
    %13 = arith.divf %9, %12 : vector<1x128xf32>
    %c0_5 = arith.constant 0 : index
    %c0_6 = arith.constant 0 : index
    %14 = vector.load %arg2[%c0_5, %c0_6] : memref<1x128xf32, #tpu.memory_space<vmem>>, vector<1x128xf32>
    tpu.vector_store %arg2[%c0_5, %c0_6], %13 {strides = array<i32>} : memref<1x128xf32, #tpu.memory_space<vmem>>, vector<1x128xf32>,
    return
  }
}

</mosaic_0001>

<bundles_post_ra>
// kernel: tpu_custom_call.1
= control target key start
LH: loop header
LB: loop body
LE: loop exit
PB: predicated region body
PF: predicated region fallthrough
CT: control target
= control target key end

     0   :  { %7 = vsyncpa [#allocation3], 0  ;;  %s154_s0 = inlined_call_operand.hbm [shape: f32[1,128], index: 0, kind: input, shape index: {}]   ;;  %s155_s1 = inlined_call_operand.vmem [shape: f32[1,128], index: 1, kind: input, shape index: {}]   ;;  %s156_s2 = inlined_call_operand.hbm [shape: f32[1,128], index: 2, kind: output, shape index: {}]  }
   0x1   :  { %8 = vsyncpa [#allocation4], 0  ;;  %s110_s9 = smov [#allocation2]   ;;  %s62_s13 = scalar_lea.hbm %s154_s0, 16 }
   0x2   :  { %s15_s10 = sshll.u32 %s110_s9, 4  ;;  %p63_p0 = scmp.ne.s32.totalorder %s154_s0, %s62_s13  ;;  %s16_s10 = int_to_ptr.vmem [resolvable:$true] %s15_s10 }
   0x3   :  { %p66_p1 = scmp.lt.u32.totalorder %s62_s13, %s154_s0 }
   0x5   :  { %p68_p2 = pnand %p66_p1, %p63_p0 }
   0x7   :  { %71 = shalt.err (!%p68_p2)
}
   0x8   :  { %s72_s18 = scalar_lea.vmem %s16_s10, 16  ;;  %s76_s19 = scalar_lea.vmem %s16_s10, 32 }
   0x9   :  { %p73_p3 = scmp.ne.s32.totalorder %s16_s10, %s72_s18  ;;  %p77_p4 = scmp.lt.s32.totalorder %s16_s10, %s16_s10 }
   0xa   :  { %p78_p5 = scmp.lt.s32.totalorder %s76_s19, %s72_s18 }
   0xc   :  { %p79_p6 = por %p78_p5, %p77_p4 }
   0xe   :  { %p80_p7 = pnand %p79_p6, %p73_p3 }
  0x10   :  { %83 = shalt.err (!%p80_p7)
}
  0x11   :  { %18 = dma.hbm_to_vmem [thread:$0]  %s154_s0, 16, %s16_s10, [#allocation3]  }
  0x12   :  { %106 = dma.done.wait [#allocation3], 16  }
  0x13   :  { %107 = vsyncadd [#allocation3], 4294967280  ;;  %v24_v0 = vld [vmem:[#allocation2] sm:$0x1]  ;;  %vm28_vm0 = vcmask 1040384   ;;  %s111_s0 = smov [#allocation5]  }
  0x14   :  { %v25_v1 = vld [vmem:[%s155_s1] sm:$0x1]  ;;  %s47_s24 = sshll.u32 %s111_s0, 4  ;;  %s48_s24 = int_to_ptr.vmem [resolvable:$true] %s47_s24 }
  0x15   :  { %v26_v2 = vadd.f32 %v25_v1, %v24_v0  ;;  %s84_s1 = scalar_lea.vmem %s48_s24, 16  ;;  %s88_s25 = scalar_lea.vmem %s48_s24, 32 }
  0x16   :  { %p85_p8 = scmp.ne.s32.totalorder %s48_s24, %s84_s1  ;;  %p89_p9 = scmp.lt.s32.totalorder %s48_s24, %s48_s24 }
  0x17   :  { %v27_v3 = vmul.f32 2.0, %v26_v2  ;;  %p90_p10 = scmp.lt.s32.totalorder %s88_s25, %s84_s1 }
  0x19   :  { %v29_v4 = vsel %vm28_vm0, %v27_v3, -inf  ;;  %p91_p11 = por %p90_p10, %p89_p9 }
  0x1a   :  { %30 = vmax.xlane.f32.xlu0 %v29_v4 }
  0x1b   :  { %p92_p12 = pnand %p91_p11, %p85_p8 }
  0xa7   :  { %v31_v5 = vpop.xlane.xlu0 %30 }
  0xa8   :  { %v32_v6 = vsub.f32 %v27_v3, %v31_v5 }
  0xaa   :  { %v33_v7 = vmul.f32 1.442695, %v32_v6 }
  0xac   :  { %58 = vpow2.f32 %v33_v7 }
  0xb6   :  { %v59_v8 = vpop.eup %58 }
  0xb7   :  { %v35_v9 = vsel %vm28_vm0, %v59_v8, 0.0 }
  0xb8   :  { %36 = vadd.xlane.f32.xlu0 %v35_v9 }
 0x145   :  { %v37_v10 = vpop.xlane.xlu0 %36 }
 0x146   :  { %60 = vrcp.f32 %v37_v10 }
 0x150   :  { %v61_v11 = vpop.eup %60 }
 0x151   :  { %v39_v12 = vmul.f32 %v61_v11, %v59_v8 }
 0x153   :  { %40 = vst [vmem:[#allocation5] sm:$0x1] %v39_v12 }
 0x154   :  { %95 = shalt.err (!%p92_p12)
}
 0x155   :  { %s96_s28 = scalar_lea.hbm %s156_s2, 16 }
 0x156   :  { %p97_p13 = scmp.ne.s32.totalorder %s156_s2, %s96_s28  ;;  %p100_p0 = scmp.lt.u32.totalorder %s96_s28, %s156_s2 }
 0x158   :  { %p102_p1 = pnand %p100_p0, %p97_p13 }
 0x15a   :  { %105 = shalt.err (!%p102_p1)
}
 0x15b   :  { %50 = dma.vmem_to_hbm [thread:$0]  %s48_s24, 16, %s156_s2, [#allocation4]  }
 0x15c   :  { %108 = dma.done.wait [#allocation4], 16  }
 0x15d   :  { %109 = vsyncadd [#allocation4], 4294967280 }
 0x15e   :  { %54 = vsyncpa [#allocation3], 1 }
 0x15f   :  { %55 = vsyncpa [#allocation4], 1 }

</bundles_post_ra>
